<compile_context>
chip_gen: v7x
topology: tpu7x:2x2x1
jax: 0.10.0
libtpu: 0.0.40
codegen_flags: <defaults>
</compile_context>

<pallas_src>
import functools

import jax
import jax.numpy as jnp
from jax.experimental import pallas as pl
from jax.experimental.pallas import tpu as pltpu


def _round_up(x, m):
    return (x + m - 1) // m * m


def _soft_argmax_mse_kernel(x_ref, t_ref, v_ref, out_ref, *, scale, n_rows, tile_n,
                            need_mask):
    # x_ref   : (TILE_N, D) logits tile (any float dtype, cast to f32 here)
    # t_ref   : (TILE_N, 1) targets tile
    # v_ref   : (1, D)      values (resident across the grid, constant index_map)
    # out_ref : (1, 1, 128) per-tile partial sum of squared diffs (lane-dense)
    x = x_ref[...].astype(jnp.float32) * jnp.float32(scale)
    # numerically stable exp
    m = jnp.max(x, axis=-1, keepdims=True)
    e = jnp.exp(x - m)

    vals = v_ref[...].astype(jnp.float32)                     # (1, D), broadcasts over rows
    # fused softmax normalisation: never materialise p = e / sum(e)
    num = jnp.sum(e * vals, axis=-1, keepdims=True)           # (TILE_N, 1)
    den = jnp.sum(e, axis=-1, keepdims=True)                  # (TILE_N, 1)
    sev = num / den                                           # exact per-row divide only

    tgt = t_ref[...].astype(jnp.float32)                      # (TILE_N, 1)
    diff = sev - tgt

    if need_mask:
        # mask rows past the true row count (partial last tile reads garbage)
        pid = pl.program_id(0)
        row = jax.lax.broadcasted_iota(jnp.int32, diff.shape, 0) + pid * tile_n
        diff = jnp.where(row < n_rows, diff, 0.0)

    partial = jnp.sum(diff * diff)                            # f32 scalar
    out_ref[...] = jnp.full((1, 1, 128), partial, jnp.float32)


def soft_argmax_mse_loss(outputs, targets, values, scale=1.0, *, max_block_rows=4096):
    """Pallas equivalent of SoftArgmaxMSELoss.forward."""
    values = values.astype(jnp.float32)
    if outputs.ndim == 3:
        B, S, D = outputs.shape
        x = outputs.reshape(B * S, D)
        t = targets.reshape(B * S, 1)
    elif outputs.ndim == 2:
        B, D = outputs.shape
        x = outputs
        t = targets.reshape(B, 1)
    else:
        raise ValueError("The outputs tensor should be either 2D or 3D.")

    N = x.shape[0]

    # Adaptive row-tile: target ~4 MiB of logits per block (input dtype), so the
    # double-buffered working set (2 inputs x 2 buffers) stays well under the
    # scoped-VMEM defaults while tiles stay big enough to hit the HBM roofline.
    itemsize = jnp.dtype(x.dtype).itemsize
    target_block_bytes = 4 * 1024 * 1024
    rows_cap = max(8, (target_block_bytes // max(1, D * itemsize)) // 8 * 8)
    tile_n = min(int(max_block_rows), int(rows_cap), _round_up(N, 8))
    tile_n = _round_up(tile_n, 8)
    num_tiles = (N + tile_n - 1) // tile_n
    need_mask = (N % tile_n) != 0

    v2 = values.reshape(1, D)

    kernel = functools.partial(
        _soft_argmax_mse_kernel,
        scale=float(scale),
        n_rows=N,
        tile_n=tile_n,
        need_mask=need_mask,
    )

    partials = pl.pallas_call(
        kernel,
        out_shape=jax.ShapeDtypeStruct((num_tiles, 1, 128), jnp.float32),
        grid=(num_tiles,),
        in_specs=[
            pl.BlockSpec((tile_n, D), lambda i: (i, 0)),   # logits tile
            pl.BlockSpec((tile_n, 1), lambda i: (i, 0)),   # targets tile
            pl.BlockSpec((1, D), lambda i: (0, 0)),        # values (resident)
        ],
        out_specs=pl.BlockSpec((1, 1, 128), lambda i: (i, 0, 0)),
        compiler_params=pltpu.CompilerParams(
            dimension_semantics=("parallel",),
            vmem_limit_bytes=64 * 1024 * 1024,
        ),
    )(x, t, v2)

    # factor 1/(N * last^2) out of the loop; tiny final reduction outside the kernel
    last = values[-1]
    inv_norm = 1.0 / (jnp.float32(N) * last * last)
    return jnp.sum(partials[:, 0, 0]) * inv_norm


def _reference(outputs, targets, values, scale=1.0):
    values = values.astype(jnp.float32)
    p = jax.nn.softmax(outputs.astype(jnp.float32) * scale, axis=-1)
    sev = jnp.einsum("...d,d->...", p, values) / values[-1]
    return jnp.mean((sev - targets.astype(jnp.float32) / values[-1]) ** 2)


if __name__ == "__main__":
    key = jax.random.PRNGKey(0)
    k1, k2, k3, k4 = jax.random.split(key, 4)

    # 3D case: (batch, seq, dim)
    B, S, D = 2, 8, 32
    outputs3 = jax.random.normal(k1, (B, S, D), dtype=jnp.float32)
    values = jnp.arange(D, dtype=jnp.float32)            # e.g. bin centers 0..D-1
    targets3 = jax.random.uniform(k2, (B, S), dtype=jnp.float32) * float(D - 1)

    loss3 = soft_argmax_mse_loss(outputs3, targets3, values, scale=1.0)
    jax.block_until_ready(loss3)
    ref3 = _reference(outputs3, targets3, values, scale=1.0)
    assert jnp.allclose(loss3, ref3, rtol=1e-5, atol=1e-6), (loss3, ref3)

    # 2D case with a row count that is not a multiple of 8 (exercises row masking)
    B2 = 13
    outputs2 = jax.random.normal(k3, (B2, D), dtype=jnp.float32)
    targets2 = jax.random.uniform(k4, (B2,), dtype=jnp.float32) * float(D - 1)

    loss2 = soft_argmax_mse_loss(outputs2, targets2, values, scale=2.0)
    jax.block_until_ready(loss2)
    ref2 = _reference(outputs2, targets2, values, scale=2.0)
    assert jnp.allclose(loss2, ref2, rtol=1e-5, atol=1e-6), (loss2, ref2)

    print("KERNEL_OK")
</pallas_src>

<mosaic_0001>
module attributes {stable_mosaic.version = 11 : i64} {
  func.func @_soft_argmax_mse_kernel(%arg0: i32, %arg1: memref<16x32xf32, #tpu.memory_space<vmem>>, %arg2: memref<16x1xf32, #tpu.memory_space<vmem>>, %arg3: memref<1x32xf32, #tpu.memory_space<vmem>>, %arg4: memref<1x1x128xf32, #tpu.memory_space<vmem>>) attributes {dimension_semantics = [#tpu.dimension_semantics<parallel>], iteration_bounds = array<i64: 1>, scalar_prefetch = 0 : i64, scratch_operands = 0 : i64, tpu.core_type = #tpu.core_type<tc>, window_params = [{transform_indices = @transform_0, window_bounds = array<i64: 16, 32>}, {transform_indices = @transform_1, window_bounds = array<i64: 16, 1>}, {pipeline_mode = #tpu.pipeline_mode<synchronous>, transform_indices = @transform_2, window_bounds = array<i64: 1, 32>}, {transform_indices = @transform_3, window_bounds = array<i64: 1, 1, 128>}]} {
    %c0 = arith.constant 0 : index
    %c0_0 = arith.constant 0 : index
    %0 = vector.load %arg1[%c0, %c0_0] : memref<16x32xf32, #tpu.memory_space<vmem>>, vector<16x32xf32>
    %cst = arith.constant 1.000000e+00 : f32
    %1 = vector.broadcast %cst : f32 to vector<16x32xf32>
    %2 = arith.mulf %0, %1 : vector<16x32xf32>
    %cst_1 = arith.constant dense<0xFF800000> : vector<16xf32>
    %3 = vector.multi_reduction <maximumf>, %2, %cst_1 [1] : vector<16x32xf32> to vector<16xf32>
    %4 = vector.shape_cast %3 : vector<16xf32> to vector<16x1xf32>
    %5 = vector.broadcast %4 : vector<16x1xf32> to vector<16x32xf32>
    %6 = arith.subf %2, %5 : vector<16x32xf32>
    %7 = math.exp %6 : vector<16x32xf32>
    %c0_2 = arith.constant 0 : index
    %c0_3 = arith.constant 0 : index
    %8 = vector.load %arg3[%c0_2, %c0_3] : memref<1x32xf32, #tpu.memory_space<vmem>>, vector<1x32xf32>
    %9 = vector.broadcast %8 : vector<1x32xf32> to vector<16x32xf32>
    %10 = arith.mulf %7, %9 : vector<16x32xf32>
    %cst_4 = arith.constant dense<0.000000e+00> : vector<16xf32>
    %11 = vector.multi_reduction <add>, %10, %cst_4 [1] : vector<16x32xf32> to vector<16xf32>
    %12 = vector.shape_cast %11 : vector<16xf32> to vector<16x1xf32>
    %cst_5 = arith.constant dense<0.000000e+00> : vector<16xf32>
    %13 = vector.multi_reduction <add>, %7, %cst_5 [1] : vector<16x32xf32> to vector<16xf32>
    %14 = vector.shape_cast %13 : vector<16xf32> to vector<16x1xf32>
    %15 = arith.divf %12, %14 : vector<16x1xf32>
    %c0_6 = arith.constant 0 : index
    %c0_7 = arith.constant 0 : index
    %16 = vector.load %arg2[%c0_6, %c0_7] : memref<16x1xf32, #tpu.memory_space<vmem>>, vector<16x1xf32>
    %17 = arith.subf %15, %16 : vector<16x1xf32>
    %18 = arith.mulf %17, %17 : vector<16x1xf32>
    %19 = vector.shape_cast %18 : vector<16x1xf32> to vector<1x16x1xf32>
    %cst_8 = arith.constant dense<0.000000e+00> : vector<1xf32>
    %20 = vector.multi_reduction <add>, %19, %cst_8 [1, 2] : vector<1x16x1xf32> to vector<1xf32>
    %21 = vector.shape_cast %20 : vector<1xf32> to vector<1x1x1xf32>
    %22 = vector.extract %21[0, 0, 0] : f32 from vector<1x1x1xf32>
    %23 = vector.broadcast %22 : f32 to vector<1x1x128xf32>
    %c0_9 = arith.constant 0 : index
    %c0_10 = arith.constant 0 : index
    %c0_11 = arith.constant 0 : index
    %24 = vector.load %arg4[%c0_9, %c0_10, %c0_11] : memref<1x1x128xf32, #tpu.memory_space<vmem>>, vector<1x1x128xf32>
    tpu.vector_store %arg4[%c0_9, %c0_10, %c0_11], %23 {strides = array<i32>} : memref<1x1x128xf32, #tpu.memory_space<vmem>>, vector<1x1x128xf32>,
    return
  }
  func.func @transform_0(%arg0: i32) -> (i32, i32) {
    %c0_i32 = arith.constant 0 : i32
    %c0_i32_0 = arith.constant 0 : i32
    return %arg0, %c0_i32 : i32, i32
  }
  func.func @transform_1(%arg0: i32) -> (i32, i32) {
    %c0_i32 = arith.constant 0 : i32
    %c0_i32_0 = arith.constant 0 : i32
    return %arg0, %c0_i32 : i32, i32
  }
  func.func @transform_2(%arg0: i32) -> (i32, i32) {
    %c0_i32 = arith.constant 0 : i32
    %c0_i32_0 = arith.constant 0 : i32
    %c0_i32_1 = arith.constant 0 : i32
    return %c0_i32, %c0_i32_0 : i32, i32
  }
  func.func @transform_3(%arg0: i32) -> (i32, i32, i32) {
    %c0_i32 = arith.constant 0 : i32
    %c0_i32_0 = arith.constant 0 : i32
    %c0_i32_1 = arith.constant 0 : i32
    return %arg0, %c0_i32, %c0_i32_0 : i32, i32, i32
  }
}

</mosaic_0001>

<bundles_post_ra>
// kernel: tpu_custom_call.1
= control target key start
LH: loop header
LB: loop body
LE: loop exit
PB: predicated region body
PF: predicated region fallthrough
CT: control target
= control target key end

     0   :  { %8 = vsyncpa [#allocation3], 0  ;;  %s329_s0 = inlined_call_operand.hbm [shape: f32[16,32], index: 0, kind: input, shape index: {}]   ;;  %s330_s1 = inlined_call_operand.hbm [shape: f32[16,1], index: 1, kind: input, shape index: {}]   ;;  %s331_s2 = inlined_call_operand.hbm [shape: f32[1,32], index: 2, kind: input, shape index: {}]   ;;  %s332_s3 = inlined_call_operand.hbm [shape: f32[1,1,128], index: 3, kind: output, shape index: {}]  }
   0x1   :  { %9 = vsyncpa [#allocation6], 0 }
   0x2   :  { %10 = vsyncpa [#allocation4], 0  ;;  %s242_s12 = smov [#allocation5]   ;;  %s243_s14 = smov [#allocation2]  }
   0x3   :  { %s28_s13 = sshll.u32 %s242_s12, 4  ;;  %s16_s15 = sshll.u32 %s243_s14, 4  ;;  %s29_s13 = int_to_ptr.vmem [resolvable:$true] %s28_s13  ;;  %s268_s15 = int_to_ptr.vmem [resolvable:$true] %s16_s15 }
   0x4   :  { %s148_s18 = scalar_lea.hbm %s330_s1, 256 }
   0x5   :  { %p149_p0 = scmp.ne.s32.totalorder %s330_s1, %s148_s18  ;;  %p152_p1 = scmp.lt.u32.totalorder %s148_s18, %s330_s1 }
   0x7   :  { %p154_p2 = pnand %p152_p1, %p149_p0 }
   0x9   :  { %157 = shalt.err (!%p154_p2)
}
   0xa   :  { %s158_s23 = scalar_lea.vmem %s29_s13, 256  ;;  %p163_p4 = scmp.lt.s32.totalorder %s29_s13, %s29_s13 }
   0xb   :  { %p159_p3 = scmp.ne.s32.totalorder %s29_s13, %s158_s23  ;;  %p164_p5 = scmp.lt.s32.totalorder %s158_s23, %s158_s23 }
   0xd   :  { %p165_p6 = por %p164_p5, %p163_p4 }
   0xf   :  { %p166_p7 = pnand %p165_p6, %p159_p3 }
  0x11   :  { %169 = shalt.err (!%p166_p7)
}
  0x12   :  { %s244_s24 = smov 128   ;;  %s245_s25 = smov 8  }
  0x13   :  { %34 = dma.hbm_to_vmem [thread:$0]  %s330_s1, 256, %s29_s13, [#allocation6], %s244_s24, %s244_s24, %s245_s25  }
  0x14   :  { %s170_s30 = scalar_lea.hbm %s329_s0, 256 }
  0x15   :  { %p171_p8 = scmp.ne.s32.totalorder %s329_s0, %s170_s30  ;;  %p174_p9 = scmp.lt.u32.totalorder %s170_s30, %s329_s0 }
  0x17   :  { %p176_p10 = pnand %p174_p9, %p171_p8 }
  0x19   :  { %179 = shalt.err (!%p176_p10)
}
  0x1a   :  { %s180_s8 = scalar_lea.vmem %s268_s15, 256  ;;  %p185_p12 = scmp.lt.s32.totalorder %s268_s15, %s268_s15 }
  0x1b   :  { %p181_p11 = scmp.ne.s32.totalorder %s268_s15, %s180_s8  ;;  %p186_p13 = scmp.lt.s32.totalorder %s180_s8, %s180_s8 }
  0x1d   :  { %p187_p0 = por %p186_p13, %p185_p12 }
  0x1f   :  { %p188_p1 = pnand %p187_p0, %p181_p11 }
  0x21   :  { %191 = shalt.err (!%p188_p1)
}
  0x22   :  { %22 = dma.hbm_to_vmem [thread:$0]  %s329_s0, 256, %s268_s15, [#allocation3], %s244_s24, %s244_s24, %s245_s25  }
  0x23   :  { %s246_s10 = smov [#allocation7]   ;;  %s192_s14 = scalar_lea.hbm %s331_s2, 16 }
  0x24   :  { %s41_s11 = sshll.u32 %s246_s10, 4  ;;  %p193_p2 = scmp.ne.s32.totalorder %s331_s2, %s192_s14  ;;  %s42_s11 = int_to_ptr.vmem [resolvable:$true] %s41_s11 }
  0x25   :  { %p196_p3 = scmp.lt.u32.totalorder %s192_s14, %s331_s2 }
  0x27   :  { %p198_p4 = pnand %p196_p3, %p193_p2 }
  0x29   :  { %201 = shalt.err (!%p198_p4)
}
  0x2a   :  { %s202_s20 = scalar_lea.vmem %s42_s11, 16  ;;  %s206_s0 = scalar_lea.vmem %s42_s11, 32 }
  0x2b   :  { %p203_p5 = scmp.ne.s32.totalorder %s42_s11, %s202_s20  ;;  %p207_p6 = scmp.lt.s32.totalorder %s42_s11, %s42_s11 }
  0x2c   :  { %p208_p7 = scmp.lt.s32.totalorder %s206_s0, %s202_s20 }
  0x2e   :  { %p209_p8 = por %p208_p7, %p207_p6 }
  0x30   :  { %p210_p9 = pnand %p209_p8, %p203_p5 }
  0x32   :  { %213 = shalt.err (!%p210_p9)
}
  0x33   :  { %44 = dma.hbm_to_vmem [thread:$0]  %s331_s2, 16, %s42_s11, [#allocation6]  }
  0x34   :  { %236 = dma.done.wait [#allocation3], 256  }
  0x35   :  { %237 = vsyncadd [#allocation3], 4294967040 }
  0x36   :  { %238 = dma.done.wait [#allocation6], 272  }
  0x37   :  { %239 = vsyncadd [#allocation6], 4294967024  ;;  %vm56_vm0 = vcmask 261120   ;;  %v54_v0 = vld [vmem:[#allocation2] sm:$0xff]  ;;  %v55_v1 = vld [vmem:[#allocation2 + $0x8] sm:$0xff]  ;;  %vm100_vm1 = vcmask 7168  }
  0x38   :  { %v57_v2 = vsel %vm56_vm0, %v54_v0, -inf  ;;  %v60_v3 = vsel %vm56_vm0, %v55_v1, -inf  ;;  %v131_v10 = vld [vmem:[#allocation7] ss:$0 sm:$0xff]  ;;  %v94_v22 = vld [vmem:[#allocation5] sm:$0xff]  ;;  %v95_v27 = vld [vmem:[#allocation5 + $0x8] sm:$0xff] }
  0x39   :  { %58 = vmax.xlane.f32.xlu0 %v57_v2  ;;  %s247_s2 = smov [#allocation8]  }
  0x3a   :  { %s121_s22 = sshll.u32 %s247_s2, 4  ;;  %s122_s22 = int_to_ptr.vmem [resolvable:$true] %s121_s22 }
  0x3b   :  { %s214_s24 = scalar_lea.vmem %s122_s22, 16  ;;  %s218_s25 = scalar_lea.vmem %s122_s22, 32 }
  0x3c   :  { %p215_p10 = scmp.ne.s32.totalorder %s122_s22, %s214_s24  ;;  %p219_p11 = scmp.lt.s32.totalorder %s122_s22, %s122_s22 }
  0x3d   :  { %61 = vmax.xlane.f32.xlu0 %v60_v3  ;;  %p220_p12 = scmp.lt.s32.totalorder %s218_s25, %s214_s24 }
  0x3f   :  { %p221_p13 = por %p220_p12, %p219_p11 }
  0x41   :  { %p222_p0 = pnand %p221_p13, %p215_p10 }
  0xc6   :  { %v59_v4 = vpop.xlane.xlu0 %58 }
  0xc7   :  { %v63_v5 = vsub.f32 %v54_v0, %v59_v4 }
  0xc9   :  { %v65_v6 = vmul.f32 1.442695, %v63_v5 }
  0xca   :  { %v62_v7 = vpop.xlane.xlu0 %61 }
  0xcb   :  { %140 = vpow2.f32 %v65_v6  ;;  %v64_v8 = vsub.f32 %v55_v1, %v62_v7 }
  0xcd   :  { %v67_v9 = vmul.f32 1.442695, %v64_v8 }
  0xcf   :  { %142 = vpow2.f32 %v67_v9 }
  0xd5   :  { %v141_v11 = vpop.eup %140 }
  0xd6   :  { %v84_v12 = vsel %vm56_vm0, %v141_v11, 0.0  ;;  %v76_v13 = vmul.f32 %v141_v11, %v131_v10 }
  0xd7   :  { %85 = vadd.xlane.f32.xlu1 %v84_v12 }
  0xd8   :  { %v78_v14 = vsel %vm56_vm0, %v76_v13, 0.0 }
  0xd9   :  { %v143_v15 = vpop.eup %142  ;;  %79 = vadd.xlane.f32.xlu0 %v78_v14 }
  0xda   :  { %v87_v16 = vsel %vm56_vm0, %v143_v15, 0.0  ;;  %v77_v17 = vmul.f32 %v143_v15, %v131_v10 }
  0xdb   :  { %88 = vadd.xlane.f32.xlu1 %v87_v16 }
  0xdc   :  { %v81_v18 = vsel %vm56_vm0, %v77_v17, 0.0 }
  0xdf   :  { %82 = vadd.xlane.f32.xlu1 %v81_v18 }
 0x164   :  { %v86_v19 = vpop.xlane.xlu1 %85 }
 0x165   :  { %144 = vrcp.f32 %v86_v19 }
 0x166   :  { %v80_v23 = vpop.xlane.xlu0 %79 }
 0x168   :  { %v89_v20 = vpop.xlane.xlu1 %88 }
 0x169   :  { %146 = vrcp.f32 %v89_v20 }
 0x16c   :  { %v83_v28 = vpop.xlane.xlu1 %82 }
 0x16f   :  { %v145_v21 = vpop.eup %144 }
 0x170   :  { %v91_v24 = vmul.f32 %v145_v21, %v80_v23 }
 0x172   :  { %v96_v25 = vsub.f32 %v91_v24, %v94_v22 }
 0x173   :  { %v147_v26 = vpop.eup %146 }
 0x174   :  { %v93_v29 = vmul.f32 %v147_v26, %v83_v28  ;;  %v98_v30 = vmul.f32 %v96_v25, %v96_v25 }
 0x176   :  { %v97_v31 = vsub.f32 %v93_v29, %v95_v27  ;;  %v101_v33 = vsel %vm100_vm1, %v98_v30, 0.0 }
 0x178   :  { %v99_v32 = vmul.f32 %v97_v31, %v97_v31 }
 0x17a   :  { %v102_v34 = vsel %vm100_vm1, %v99_v32, 0.0 }
 0x17b   :  { %v103_v35 = vadd.f32 %v102_v34, %v101_v33 }
 0x17d   :  { %104 = vadd.xlane.f32.xlu0 %v103_v35 }
 0x20a   :  { %v105_v36 = vpop.xlane.xlu0 %104 }
 0x20b   :  { %v106_v37 = vrot.slane %v105_v36, 4 }
 0x20d   :  { %v107_v38 = vadd.f32 %v106_v37, %v105_v36 }
 0x20f   :  { %v108_v39 = vrot.slane %v107_v38, 2 }
 0x211   :  { %v109_v40 = vadd.f32 %v108_v39, %v107_v38 }
 0x213   :  { %v110_v41 = vrot.slane %v109_v40, 1 }
 0x215   :  { %v111_v42 = vadd.f32 %v110_v41, %v109_v40 }
 0x217   :  { %132 = vpush %v111_v42 }
 0x248   :  { %s133_s23 = spop %132 }
 0x249   :  { %v113_v43 = vstv %s133_s23 }
 0x24a   :  { %114 = vst [vmem:[#allocation8] sm:$0x1] %v113_v43 }
 0x24b   :  { %225 = shalt.err (!%p222_p0)
}
 0x24c   :  { %s226_s28 = scalar_lea.hbm %s332_s3, 16 }
 0x24d   :  { %p227_p1 = scmp.ne.s32.totalorder %s332_s3, %s226_s28  ;;  %p230_p2 = scmp.lt.u32.totalorder %s226_s28, %s332_s3 }
 0x24f   :  { %p232_p3 = pnand %p230_p2, %p227_p1 }
 0x251   :  { %235 = shalt.err (!%p232_p3)
}
 0x252   :  { %124 = dma.vmem_to_hbm [thread:$0]  %s122_s22, 16, %s332_s3, [#allocation4]  }
 0x253   :  { %240 = dma.done.wait [#allocation4], 16  }
 0x254   :  { %241 = vsyncadd [#allocation4], 4294967280 }
 0x255   :  { %128 = vsyncpa [#allocation3], 1 }
 0x256   :  { %129 = vsyncpa [#allocation6], 1 }
 0x257   :  { %130 = vsyncpa [#allocation4], 1 }

</bundles_post_ra>
